<compile_context>
chip_gen: v7x
topology: tpu7x:2x2x1
jax: 0.10.0
libtpu: 0.0.40
codegen_flags: <defaults>
</compile_context>

<pallas_src>
import jax
import jax.numpy as jnp
from jax.experimental import pallas as pl
from jax.experimental.pallas import tpu as pltpu

EPS = 1e-5


def mlp_kernel(x_ref,
               w1, g1, be1,
               w2, g2, be2,
               w3, g3, be3,
               w4, g4, be4,
               w5r, b5, o_ref):
    def lin_bn_relu(h, w_r, g_r, be_r):
        # Linear (MXU). Pre-BN bias omitted: it cancels exactly in training-mode BN.
        h = jnp.dot(h, w_r[...], preferred_element_type=jnp.float32)
        n = h.shape[1]
        # Fused one-pass batch statistics: ONE sublane reduce over the
        # lane-concatenated [h, h*h] slab, then split into mu / E[x^2].
        stats = jnp.mean(jnp.concatenate([h, h * h], axis=1), axis=0, keepdims=True)
        mu = stats[:, :n]
        ex2 = stats[:, n:]
        var = jnp.maximum(ex2 - mu * mu, 0.0)   # clamp vs f32 cancellation
        # Fold BN (normalize + affine) into a single per-feature scale/shift.
        scale = g_r[...] * jax.lax.rsqrt(var + EPS)   # rsqrt -> EUP slot
        shift = be_r[...] - mu * scale
        # scale/shift + ReLU: 2 broadcast VPU ops per element + max.
        return jnp.maximum(h * scale + shift, 0.0)

    h = x_ref[...]
    h = lin_bn_relu(h, w1, g1, be1)
    h = lin_bn_relu(h, w2, g2, be2)
    h = lin_bn_relu(h, w3, g3, be3)
    h = lin_bn_relu(h, w4, g4, be4)

    # Final Linear(32, 1): tiny tail -> VPU multiply + lane reduce (skip the MXU);
    # bias read as a scalar from SMEM. Direct (rows, 1) store (no lane-dense slab).
    o_ref[...] = jnp.sum(h * w5r[...], axis=1, keepdims=True) + b5[0]


def make_params(input_size, key):
    """Deterministic parameter init mimicking the PyTorch layer shapes."""
    sizes = [(input_size, 256), (256, 128), (128, 64), (64, 32), (32, 1)]
    params = []
    for (fan_in, fan_out) in sizes:
        key, kw, kb = jax.random.split(key, 3)
        bound = 1.0 / jnp.sqrt(fan_in)
        W = jax.random.uniform(kw, (fan_in, fan_out), jnp.float32, -bound, bound)
        b = jax.random.uniform(kb, (1, fan_out), jnp.float32, -bound, bound)
        params.append((W, b))
    # BatchNorm affine params: gamma=1, beta=0 (PyTorch default init)
    bn = [(jnp.ones((1, n), jnp.float32), jnp.zeros((1, n), jnp.float32))
          for n in (256, 128, 64, 32)]
    return params, bn


def prep_kernel_params(params):
    """One-time layout prep (done at param time, not per forward call)."""
    W5, b5 = params[4]
    w5_row = W5.T.reshape(1, -1)            # (1, 32) lane row for the VPU tail
    b5_scalar = b5.reshape(-1)              # (1,) scalar, lives in SMEM
    return w5_row, b5_scalar


def mlp_forward(x, params, bn, w5_row, b5_scalar, *, rows_per_block=8):
    """x: (n_groups * rows_per_block, input_size).

    Each rows_per_block group is an independent forward (its own BN batch stats),
    all processed in ONE pallas_call: weights stay resident in VMEM across the grid.
    """
    total, in_dim = x.shape
    assert total % rows_per_block == 0
    n_groups = total // rows_per_block

    const_blk = lambda g: (0, 0)   # weights/affine params: same block every step

    flat_args = [x]
    in_specs = [pl.BlockSpec((rows_per_block, in_dim), lambda g: (g, 0))]
    for i in range(4):
        (W, _b), (ga, be) = params[i], bn[i]   # pre-BN bias dropped (cancels in BN)
        flat_args += [W, ga, be]
        in_specs += [pl.BlockSpec(W.shape, const_blk),
                     pl.BlockSpec(ga.shape, const_blk),
                     pl.BlockSpec(be.shape, const_blk)]
    flat_args += [w5_row, b5_scalar]
    in_specs += [pl.BlockSpec(w5_row.shape, const_blk),
                 pl.BlockSpec(memory_space=pltpu.MemorySpace.SMEM)]   # scalar bias

    out = pl.pallas_call(
        mlp_kernel,
        grid=(n_groups,),
        out_shape=jax.ShapeDtypeStruct((total, 1), jnp.float32),
        in_specs=in_specs,
        out_specs=pl.BlockSpec((rows_per_block, 1), lambda g: (g, 0)),
        compiler_params=pltpu.CompilerParams(
            dimension_semantics=("parallel",)),
    )(*flat_args)
    return out


def mlp_reference(x, params, bn):
    """Pure-JAX reference with full PyTorch training-mode semantics (incl. biases)."""
    h = x
    for i in range(4):
        (W, b), (g, be) = params[i], bn[i]
        h = h @ W + b
        mu = jnp.mean(h, axis=0, keepdims=True)
        var = jnp.mean((h - mu) ** 2, axis=0, keepdims=True)
        h = (h - mu) / jnp.sqrt(var + EPS) * g + be
        h = jnp.maximum(h, 0.0)
    return h @ params[4][0] + params[4][1]


if __name__ == "__main__":
    key = jax.random.PRNGKey(0)
    key, kx, kp = jax.random.split(key, 3)

    rows_per_block = 8        # one PyTorch-style forward batch
    n_groups = 4              # independent batches amortized in one pallas_call
    input_size = 32
    x = jax.random.normal(kx, (n_groups * rows_per_block, input_size), jnp.float32)

    params, bn = make_params(input_size, kp)
    w5_row, b5_scalar = prep_kernel_params(params)

    out = mlp_forward(x, params, bn, w5_row, b5_scalar,
                      rows_per_block=rows_per_block)
    out = jax.block_until_ready(out)
    assert out.shape == (n_groups * rows_per_block, 1), out.shape

    # Reference: each group is an independent forward (its own BN batch stats).
    ref = jnp.concatenate(
        [mlp_reference(x[g * rows_per_block:(g + 1) * rows_per_block], params, bn)
         for g in range(n_groups)], axis=0)
    assert jnp.allclose(out, ref, atol=1e-4, rtol=1e-4), (
        float(jnp.max(jnp.abs(out - ref))))

    print("KERNEL_OK")
</pallas_src>

<mosaic_0001>
module attributes {stable_mosaic.version = 11 : i64} {
  func.func @mlp_kernel(%arg0: i32, %arg1: memref<8x32xf32, #tpu.memory_space<vmem>>, %arg2: memref<32x256xf32, #tpu.memory_space<vmem>>, %arg3: memref<1x256xf32, #tpu.memory_space<vmem>>, %arg4: memref<1x256xf32, #tpu.memory_space<vmem>>, %arg5: memref<256x128xf32, #tpu.memory_space<vmem>>, %arg6: memref<1x128xf32, #tpu.memory_space<vmem>>, %arg7: memref<1x128xf32, #tpu.memory_space<vmem>>, %arg8: memref<128x64xf32, #tpu.memory_space<vmem>>, %arg9: memref<1x64xf32, #tpu.memory_space<vmem>>, %arg10: memref<1x64xf32, #tpu.memory_space<vmem>>, %arg11: memref<64x32xf32, #tpu.memory_space<vmem>>, %arg12: memref<1x32xf32, #tpu.memory_space<vmem>>, %arg13: memref<1x32xf32, #tpu.memory_space<vmem>>, %arg14: memref<1x32xf32, #tpu.memory_space<vmem>>, %arg15: memref<1xf32, #tpu.memory_space<smem>>, %arg16: memref<8x1xf32, #tpu.memory_space<vmem>>) attributes {dimension_semantics = [#tpu.dimension_semantics<parallel>], iteration_bounds = array<i64: 4>, scalar_prefetch = 0 : i64, scratch_operands = 0 : i64, tpu.core_type = #tpu.core_type<tc>, window_params = [{transform_indices = @transform_0, window_bounds = array<i64: 8, 32>}, {pipeline_mode = #tpu.pipeline_mode<synchronous>, transform_indices = @transform_1, window_bounds = array<i64: 32, 256>}, {pipeline_mode = #tpu.pipeline_mode<synchronous>, transform_indices = @transform_2, window_bounds = array<i64: 1, 256>}, {pipeline_mode = #tpu.pipeline_mode<synchronous>, transform_indices = @transform_3, window_bounds = array<i64: 1, 256>}, {pipeline_mode = #tpu.pipeline_mode<synchronous>, transform_indices = @transform_4, window_bounds = array<i64: 256, 128>}, {pipeline_mode = #tpu.pipeline_mode<synchronous>, transform_indices = @transform_5, window_bounds = array<i64: 1, 128>}, {pipeline_mode = #tpu.pipeline_mode<synchronous>, transform_indices = @transform_6, window_bounds = array<i64: 1, 128>}, {pipeline_mode = #tpu.pipeline_mode<synchronous>, transform_indices = @transform_7, window_bounds = array<i64: 128, 64>}, {pipeline_mode = #tpu.pipeline_mode<synchronous>, transform_indices = @transform_8, window_bounds = array<i64: 1, 64>}, {pipeline_mode = #tpu.pipeline_mode<synchronous>, transform_indices = @transform_9, window_bounds = array<i64: 1, 64>}, {pipeline_mode = #tpu.pipeline_mode<synchronous>, transform_indices = @transform_10, window_bounds = array<i64: 64, 32>}, {pipeline_mode = #tpu.pipeline_mode<synchronous>, transform_indices = @transform_11, window_bounds = array<i64: 1, 32>}, {pipeline_mode = #tpu.pipeline_mode<synchronous>, transform_indices = @transform_12, window_bounds = array<i64: 1, 32>}, {pipeline_mode = #tpu.pipeline_mode<synchronous>, transform_indices = @transform_13, window_bounds = array<i64: 1, 32>}, {transform_indices = @transform_14, window_bounds = array<i64: 1>}, {transform_indices = @transform_15, window_bounds = array<i64: 8, 1>}]} {
    %c0 = arith.constant 0 : index
    %c0_0 = arith.constant 0 : index
    %0 = vector.load %arg1[%c0, %c0_0] : memref<8x32xf32, #tpu.memory_space<vmem>>, vector<8x32xf32>
    %c0_1 = arith.constant 0 : index
    %c0_2 = arith.constant 0 : index
    %1 = vector.load %arg2[%c0_1, %c0_2] : memref<32x256xf32, #tpu.memory_space<vmem>>, vector<32x256xf32>
    %cst = arith.constant dense<0.000000e+00> : vector<8x256xf32>
    %2 = tpu.matmul %0, %1, %cst {dimension_numbers = #tpu.dot_dimension_numbers<[1], [0], [0], [1], [0, 0, 1, 1], [], []>} : vector<8x32xf32>, vector<32x256xf32>, vector<8x256xf32> -> vector<8x256xf32>
    %3 = arith.mulf %2, %2 : vector<8x256xf32>
    %4 = tpu.concatenate %2, %3 in 1 : vector<8x256xf32>, vector<8x256xf32> -> vector<8x512xf32>
    %cst_3 = arith.constant dense<0.000000e+00> : vector<512xf32>
    %5 = vector.multi_reduction <add>, %4, %cst_3 [0] : vector<8x512xf32> to vector<512xf32>
    %6 = vector.shape_cast %5 : vector<512xf32> to vector<1x512xf32>
    %cst_4 = arith.constant 8.000000e+00 : f32
    %7 = vector.broadcast %cst_4 : f32 to vector<1x512xf32>
    %8 = arith.divf %6, %7 : vector<1x512xf32>
    %9 = vector.extract_strided_slice %8 {offsets = [0, 0], sizes = [1, 256], strides = [1, 1]} : vector<1x512xf32> to vector<1x256xf32>
    %10 = vector.extract_strided_slice %8 {offsets = [0, 256], sizes = [1, 256], strides = [1, 1]} : vector<1x512xf32> to vector<1x256xf32>
    %11 = arith.mulf %9, %9 : vector<1x256xf32>
    %12 = arith.subf %10, %11 : vector<1x256xf32>
    %cst_5 = arith.constant 0.000000e+00 : f32
    %13 = vector.broadcast %cst_5 : f32 to vector<1x256xf32>
    %14 = arith.maximumf %12, %13 : vector<1x256xf32>
    %c0_6 = arith.constant 0 : index
    %c0_7 = arith.constant 0 : index
    %15 = vector.load %arg3[%c0_6, %c0_7] : memref<1x256xf32, #tpu.memory_space<vmem>>, vector<1x256xf32>
    %cst_8 = arith.constant 9.99999974E-6 : f32
    %16 = vector.broadcast %cst_8 : f32 to vector<1x256xf32>
    %17 = arith.addf %14, %16 : vector<1x256xf32>
    %18 = math.rsqrt %17 : vector<1x256xf32>
    %19 = arith.mulf %15, %18 : vector<1x256xf32>
    %c0_9 = arith.constant 0 : index
    %c0_10 = arith.constant 0 : index
    %20 = vector.load %arg4[%c0_9, %c0_10] : memref<1x256xf32, #tpu.memory_space<vmem>>, vector<1x256xf32>
    %21 = arith.mulf %9, %19 : vector<1x256xf32>
    %22 = arith.subf %20, %21 : vector<1x256xf32>
    %23 = vector.broadcast %19 : vector<1x256xf32> to vector<8x256xf32>
    %24 = arith.mulf %2, %23 : vector<8x256xf32>
    %25 = vector.broadcast %22 : vector<1x256xf32> to vector<8x256xf32>
    %26 = arith.addf %24, %25 : vector<8x256xf32>
    %cst_11 = arith.constant 0.000000e+00 : f32
    %27 = vector.broadcast %cst_11 : f32 to vector<8x256xf32>
    %28 = arith.maximumf %26, %27 : vector<8x256xf32>
    %c0_12 = arith.constant 0 : index
    %c0_13 = arith.constant 0 : index
    %29 = vector.load %arg5[%c0_12, %c0_13] : memref<256x128xf32, #tpu.memory_space<vmem>>, vector<256x128xf32>
    %cst_14 = arith.constant dense<0.000000e+00> : vector<8x128xf32>
    %30 = tpu.matmul %28, %29, %cst_14 {dimension_numbers = #tpu.dot_dimension_numbers<[1], [0], [0], [1], [0, 0, 1, 1], [], []>} : vector<8x256xf32>, vector<256x128xf32>, vector<8x128xf32> -> vector<8x128xf32>
    %31 = arith.mulf %30, %30 : vector<8x128xf32>
    %32 = tpu.concatenate %30, %31 in 1 : vector<8x128xf32>, vector<8x128xf32> -> vector<8x256xf32>
    %cst_15 = arith.constant dense<0.000000e+00> : vector<256xf32>
    %33 = vector.multi_reduction <add>, %32, %cst_15 [0] : vector<8x256xf32> to vector<256xf32>
    %34 = vector.shape_cast %33 : vector<256xf32> to vector<1x256xf32>
    %cst_16 = arith.constant 8.000000e+00 : f32
    %35 = vector.broadcast %cst_16 : f32 to vector<1x256xf32>
    %36 = arith.divf %34, %35 : vector<1x256xf32>
    %37 = vector.extract_strided_slice %36 {offsets = [0, 0], sizes = [1, 128], strides = [1, 1]} : vector<1x256xf32> to vector<1x128xf32>
    %38 = vector.extract_strided_slice %36 {offsets = [0, 128], sizes = [1, 128], strides = [1, 1]} : vector<1x256xf32> to vector<1x128xf32>
    %39 = arith.mulf %37, %37 : vector<1x128xf32>
    %40 = arith.subf %38, %39 : vector<1x128xf32>
    %cst_17 = arith.constant 0.000000e+00 : f32
    %41 = vector.broadcast %cst_17 : f32 to vector<1x128xf32>
    %42 = arith.maximumf %40, %41 : vector<1x128xf32>
    %c0_18 = arith.constant 0 : index
    %c0_19 = arith.constant 0 : index
    %43 = vector.load %arg6[%c0_18, %c0_19] : memref<1x128xf32, #tpu.memory_space<vmem>>, vector<1x128xf32>
    %cst_20 = arith.constant 9.99999974E-6 : f32
    %44 = vector.broadcast %cst_20 : f32 to vector<1x128xf32>
    %45 = arith.addf %42, %44 : vector<1x128xf32>
    %46 = math.rsqrt %45 : vector<1x128xf32>
    %47 = arith.mulf %43, %46 : vector<1x128xf32>
    %c0_21 = arith.constant 0 : index
    %c0_22 = arith.constant 0 : index
    %48 = vector.load %arg7[%c0_21, %c0_22] : memref<1x128xf32, #tpu.memory_space<vmem>>, vector<1x128xf32>
    %49 = arith.mulf %37, %47 : vector<1x128xf32>
    %50 = arith.subf %48, %49 : vector<1x128xf32>
    %51 = vector.broadcast %47 : vector<1x128xf32> to vector<8x128xf32>
    %52 = arith.mulf %30, %51 : vector<8x128xf32>
    %53 = vector.broadcast %50 : vector<1x128xf32> to vector<8x128xf32>
    %54 = arith.addf %52, %53 : vector<8x128xf32>
    %cst_23 = arith.constant 0.000000e+00 : f32
    %55 = vector.broadcast %cst_23 : f32 to vector<8x128xf32>
    %56 = arith.maximumf %54, %55 : vector<8x128xf32>
    %c0_24 = arith.constant 0 : index
    %c0_25 = arith.constant 0 : index
    %57 = vector.load %arg8[%c0_24, %c0_25] : memref<128x64xf32, #tpu.memory_space<vmem>>, vector<128x64xf32>
    %cst_26 = arith.constant dense<0.000000e+00> : vector<8x64xf32>
    %58 = tpu.matmul %56, %57, %cst_26 {dimension_numbers = #tpu.dot_dimension_numbers<[1], [0], [0], [1], [0, 0, 1, 1], [], []>} : vector<8x128xf32>, vector<128x64xf32>, vector<8x64xf32> -> vector<8x64xf32>
    %59 = arith.mulf %58, %58 : vector<8x64xf32>
    %60 = tpu.concatenate %58, %59 in 1 : vector<8x64xf32>, vector<8x64xf32> -> vector<8x128xf32>
    %cst_27 = arith.constant dense<0.000000e+00> : vector<128xf32>
    %61 = vector.multi_reduction <add>, %60, %cst_27 [0] : vector<8x128xf32> to vector<128xf32>
    %62 = vector.shape_cast %61 : vector<128xf32> to vector<1x128xf32>
    %cst_28 = arith.constant 8.000000e+00 : f32
    %63 = vector.broadcast %cst_28 : f32 to vector<1x128xf32>
    %64 = arith.divf %62, %63 : vector<1x128xf32>
    %65 = vector.extract_strided_slice %64 {offsets = [0, 0], sizes = [1, 64], strides = [1, 1]} : vector<1x128xf32> to vector<1x64xf32>
    %66 = vector.extract_strided_slice %64 {offsets = [0, 64], sizes = [1, 64], strides = [1, 1]} : vector<1x128xf32> to vector<1x64xf32>
    %67 = arith.mulf %65, %65 : vector<1x64xf32>
    %68 = arith.subf %66, %67 : vector<1x64xf32>
    %cst_29 = arith.constant 0.000000e+00 : f32
    %69 = vector.broadcast %cst_29 : f32 to vector<1x64xf32>
    %70 = arith.maximumf %68, %69 : vector<1x64xf32>
    %c0_30 = arith.constant 0 : index
    %c0_31 = arith.constant 0 : index
    %71 = vector.load %arg9[%c0_30, %c0_31] : memref<1x64xf32, #tpu.memory_space<vmem>>, vector<1x64xf32>
    %cst_32 = arith.constant 9.99999974E-6 : f32
    %72 = vector.broadcast %cst_32 : f32 to vector<1x64xf32>
    %73 = arith.addf %70, %72 : vector<1x64xf32>
    %74 = math.rsqrt %73 : vector<1x64xf32>
    %75 = arith.mulf %71, %74 : vector<1x64xf32>
    %c0_33 = arith.constant 0 : index
    %c0_34 = arith.constant 0 : index
    %76 = vector.load %arg10[%c0_33, %c0_34] : memref<1x64xf32, #tpu.memory_space<vmem>>, vector<1x64xf32>
    %77 = arith.mulf %65, %75 : vector<1x64xf32>
    %78 = arith.subf %76, %77 : vector<1x64xf32>
    %79 = vector.broadcast %75 : vector<1x64xf32> to vector<8x64xf32>
    %80 = arith.mulf %58, %79 : vector<8x64xf32>
    %81 = vector.broadcast %78 : vector<1x64xf32> to vector<8x64xf32>
    %82 = arith.addf %80, %81 : vector<8x64xf32>
    %cst_35 = arith.constant 0.000000e+00 : f32
    %83 = vector.broadcast %cst_35 : f32 to vector<8x64xf32>
    %84 = arith.maximumf %82, %83 : vector<8x64xf32>
    %c0_36 = arith.constant 0 : index
    %c0_37 = arith.constant 0 : index
    %85 = vector.load %arg11[%c0_36, %c0_37] : memref<64x32xf32, #tpu.memory_space<vmem>>, vector<64x32xf32>
    %cst_38 = arith.constant dense<0.000000e+00> : vector<8x32xf32>
    %86 = tpu.matmul %84, %85, %cst_38 {dimension_numbers = #tpu.dot_dimension_numbers<[1], [0], [0], [1], [0, 0, 1, 1], [], []>} : vector<8x64xf32>, vector<64x32xf32>, vector<8x32xf32> -> vector<8x32xf32>
    %87 = arith.mulf %86, %86 : vector<8x32xf32>
    %88 = tpu.concatenate %86, %87 in 1 : vector<8x32xf32>, vector<8x32xf32> -> vector<8x64xf32>
    %cst_39 = arith.constant dense<0.000000e+00> : vector<64xf32>
    %89 = vector.multi_reduction <add>, %88, %cst_39 [0] : vector<8x64xf32> to vector<64xf32>
    %90 = vector.shape_cast %89 : vector<64xf32> to vector<1x64xf32>
    %cst_40 = arith.constant 8.000000e+00 : f32
    %91 = vector.broadcast %cst_40 : f32 to vector<1x64xf32>
    %92 = arith.divf %90, %91 : vector<1x64xf32>
    %93 = vector.extract_strided_slice %92 {offsets = [0, 0], sizes = [1, 32], strides = [1, 1]} : vector<1x64xf32> to vector<1x32xf32>
    %94 = vector.extract_strided_slice %92 {offsets = [0, 32], sizes = [1, 32], strides = [1, 1]} : vector<1x64xf32> to vector<1x32xf32>
    %95 = arith.mulf %93, %93 : vector<1x32xf32>
    %96 = arith.subf %94, %95 : vector<1x32xf32>
    %cst_41 = arith.constant 0.000000e+00 : f32
    %97 = vector.broadcast %cst_41 : f32 to vector<1x32xf32>
    %98 = arith.maximumf %96, %97 : vector<1x32xf32>
    %c0_42 = arith.constant 0 : index
    %c0_43 = arith.constant 0 : index
    %99 = vector.load %arg12[%c0_42, %c0_43] : memref<1x32xf32, #tpu.memory_space<vmem>>, vector<1x32xf32>
    %cst_44 = arith.constant 9.99999974E-6 : f32
    %100 = vector.broadcast %cst_44 : f32 to vector<1x32xf32>
    %101 = arith.addf %98, %100 : vector<1x32xf32>
    %102 = math.rsqrt %101 : vector<1x32xf32>
    %103 = arith.mulf %99, %102 : vector<1x32xf32>
    %c0_45 = arith.constant 0 : index
    %c0_46 = arith.constant 0 : index
    %104 = vector.load %arg13[%c0_45, %c0_46] : memref<1x32xf32, #tpu.memory_space<vmem>>, vector<1x32xf32>
    %105 = arith.mulf %93, %103 : vector<1x32xf32>
    %106 = arith.subf %104, %105 : vector<1x32xf32>
    %107 = vector.broadcast %103 : vector<1x32xf32> to vector<8x32xf32>
    %108 = arith.mulf %86, %107 : vector<8x32xf32>
    %109 = vector.broadcast %106 : vector<1x32xf32> to vector<8x32xf32>
    %110 = arith.addf %108, %109 : vector<8x32xf32>
    %cst_47 = arith.constant 0.000000e+00 : f32
    %111 = vector.broadcast %cst_47 : f32 to vector<8x32xf32>
    %112 = arith.maximumf %110, %111 : vector<8x32xf32>
    %c0_48 = arith.constant 0 : index
    %c0_49 = arith.constant 0 : index
    %113 = vector.load %arg14[%c0_48, %c0_49] : memref<1x32xf32, #tpu.memory_space<vmem>>, vector<1x32xf32>
    %114 = vector.broadcast %113 : vector<1x32xf32> to vector<8x32xf32>
    %115 = arith.mulf %112, %114 : vector<8x32xf32>
    %cst_50 = arith.constant dense<0.000000e+00> : vector<8xf32>
    %116 = vector.multi_reduction <add>, %115, %cst_50 [1] : vector<8x32xf32> to vector<8xf32>
    %117 = vector.shape_cast %116 : vector<8xf32> to vector<8x1xf32>
    %c0_51 = arith.constant 0 : index
    %118 = memref.load %arg15[%c0_51] : memref<1xf32, #tpu.memory_space<smem>>
    %119 = vector.broadcast %118 : f32 to vector<8x1xf32>
    %120 = arith.addf %117, %119 : vector<8x1xf32>
    %c0_52 = arith.constant 0 : index
    %c0_53 = arith.constant 0 : index
    %121 = vector.load %arg16[%c0_52, %c0_53] : memref<8x1xf32, #tpu.memory_space<vmem>>, vector<8x1xf32>
    tpu.vector_store %arg16[%c0_52, %c0_53], %120 {strides = array<i32>} : memref<8x1xf32, #tpu.memory_space<vmem>>, vector<8x1xf32>,
    return
  }
  func.func @transform_0(%arg0: i32) -> (i32, i32) {
    %c0_i32 = arith.constant 0 : i32
    %c0_i32_0 = arith.constant 0 : i32
    return %arg0, %c0_i32 : i32, i32
  }
  func.func @transform_1(%arg0: i32) -> (i32, i32) {
    %c0_i32 = arith.constant 0 : i32
    %c0_i32_0 = arith.constant 0 : i32
    %c0_i32_1 = arith.constant 0 : i32
    return %c0_i32, %c0_i32_0 : i32, i32
  }
  func.func @transform_2(%arg0: i32) -> (i32, i32) {
    %c0_i32 = arith.constant 0 : i32
    %c0_i32_0 = arith.constant 0 : i32
    %c0_i32_1 = arith.constant 0 : i32
    return %c0_i32, %c0_i32_0 : i32, i32
  }
  func.func @transform_3(%arg0: i32) -> (i32, i32) {
    %c0_i32 = arith.constant 0 : i32
    %c0_i32_0 = arith.constant 0 : i32
    %c0_i32_1 = arith.constant 0 : i32
    return %c0_i32, %c0_i32_0 : i32, i32
  }
  func.func @transform_4(%arg0: i32) -> (i32, i32) {
    %c0_i32 = arith.constant 0 : i32
    %c0_i32_0 = arith.constant 0 : i32
    %c0_i32_1 = arith.constant 0 : i32
    return %c0_i32, %c0_i32_0 : i32, i32
  }
  func.func @transform_5(%arg0: i32) -> (i32, i32) {
    %c0_i32 = arith.constant 0 : i32
    %c0_i32_0 = arith.constant 0 : i32
    %c0_i32_1 = arith.constant 0 : i32
    return %c0_i32, %c0_i32_0 : i32, i32
  }
  func.func @transform_6(%arg0: i32) -> (i32, i32) {
    %c0_i32 = arith.constant 0 : i32
    %c0_i32_0 = arith.constant 0 : i32
    %c0_i32_1 = arith.constant 0 : i32
    return %c0_i32, %c0_i32_0 : i32, i32
  }
  func.func @transform_7(%arg0: i32) -> (i32, i32) {
    %c0_i32 = arith.constant 0 : i32
    %c0_i32_0 = arith.constant 0 : i32
    %c0_i32_1 = arith.constant 0 : i32
    return %c0_i32, %c0_i32_0 : i32, i32
  }
  func.func @transform_8(%arg0: i32) -> (i32, i32) {
    %c0_i32 = arith.constant 0 : i32
    %c0_i32_0 = arith.constant 0 : i32
    %c0_i32_1 = arith.constant 0 : i32
    return %c0_i32, %c0_i32_0 : i32, i32
  }
  func.func @transform_9(%arg0: i32) -> (i32, i32) {
    %c0_i32 = arith.constant 0 : i32
    %c0_i32_0 = arith.constant 0 : i32
    %c0_i32_1 = arith.constant 0 : i32
    return %c0_i32, %c0_i32_0 : i32, i32
  }
  func.func @transform_10(%arg0: i32) -> (i32, i32) {
    %c0_i32 = arith.constant 0 : i32
    %c0_i32_0 = arith.constant 0 : i32
    %c0_i32_1 = arith.constant 0 : i32
    return %c0_i32, %c0_i32_0 : i32, i32
  }
  func.func @transform_11(%arg0: i32) -> (i32, i32) {
    %c0_i32 = arith.constant 0 : i32
    %c0_i32_0 = arith.constant 0 : i32
    %c0_i32_1 = arith.constant 0 : i32
    return %c0_i32, %c0_i32_0 : i32, i32
  }
  func.func @transform_12(%arg0: i32) -> (i32, i32) {
    %c0_i32 = arith.constant 0 : i32
    %c0_i32_0 = arith.constant 0 : i32
    %c0_i32_1 = arith.constant 0 : i32
    return %c0_i32, %c0_i32_0 : i32, i32
  }
  func.func @transform_13(%arg0: i32) -> (i32, i32) {
    %c0_i32 = arith.constant 0 : i32
    %c0_i32_0 = arith.constant 0 : i32
    %c0_i32_1 = arith.constant 0 : i32
    return %c0_i32, %c0_i32_0 : i32, i32
  }
  func.func @transform_14(%arg0: i32) -> i32 {
    %c0_i32 = arith.constant 0 : i32
    %c0_i32_0 = arith.constant 0 : i32
    return %c0_i32 : i32
  }
  func.func @transform_15(%arg0: i32) -> (i32, i32) {
    %c0_i32 = arith.constant 0 : i32
    %c0_i32_0 = arith.constant 0 : i32
    return %arg0, %c0_i32 : i32, i32
  }
}

</mosaic_0001>

<bundles_post_ra>
// kernel: tpu_custom_call.1
= control target key start
LH: loop header
LB: loop body
LE: loop exit
PB: predicated region body
PF: predicated region fallthrough
CT: control target
= control target key end

     0   :  { %s1891_s0 = inlined_call_operand.vmem [shape: f32[32,32], index: 0, kind: input, shape index: {}]   ;;  %s1892_s1 = inlined_call_operand.hbm [shape: f32[32,256], index: 1, kind: input, shape index: {}]   ;;  %s1893_s2 = inlined_call_operand.vmem [shape: f32[1,256], index: 2, kind: input, shape index: {}]   ;;  %s1894_s3 = inlined_call_operand.vmem [shape: f32[1,256], index: 3, kind: input, shape index: {}]   ;;  %s1895_s4 = inlined_call_operand.vmem [shape: f32[256,128], index: 4, kind: input, shape index: {}]   ;;  %s1896_s5 = inlined_call_operand.vmem [shape: f32[1,128], index: 5, kind: input, shape index: {}]   ;;  %s1897_s6 = inlined_call_operand.vmem [shape: f32[1,128], index: 6, kind: input, shape index: {}]   ;;  %s1898_s7 = inlined_call_operand.vmem [shape: f32[128,64], index: 7, kind: input, shape index: {}]   ;;  %s1899_s8 = inlined_call_operand.vmem [shape: f32[1,64], index: 8, kind: input, shape index: {}]   ;;  %s1900_s9 = inlined_call_operand.vmem [shape: f32[1,64], index: 9, kind: input, shape index: {}]   ;;  %s1901_s10 = inlined_call_operand.vmem [shape: f32[64,32], index: 10, kind: input, shape index: {}]   ;;  %s1902_s11 = inlined_call_operand.vmem [shape: f32[1,32], index: 11, kind: input, shape index: {}]   ;;  %s1903_s12 = inlined_call_operand.vmem [shape: f32[1,32], index: 12, kind: input, shape index: {}]   ;;  %s1904_s13 = inlined_call_operand.vmem [shape: f32[1,32], index: 13, kind: input, shape index: {}]   ;;  %s1905_s14 = inlined_call_operand.<no memory space> [shape: f32[1], index: 14, kind: input, shape index: {}]   ;;  %s1906_s15 = inlined_call_operand.vmem [shape: f32[32,1], index: 15, kind: output, shape index: {}]  }
   0x1   :  { %20 = sst [smem:[#allocation2]] %s1905_s14 }
   0x2   :  { %21 = vsyncpa [#allocation4], 0  ;;  %s1589_s20 = smov 0  }
   0x3 LB: > { %s1595_s21 = sadd.s32 4294967295, %s1494_s20   ;;  %p1215_p0 = scmp.ge.s32.totalorder %s1494_s20, 1  ;;  %s1494_s20 = sphi %s1589_s20, %s27_s20  }
   0x4   : > { %p378_p1 = scmp.lt.s32.totalorder %s1494_s20, 5  ;;  %s1496_s22 = smov [#allocation3]  }
   0x5   : > { %s390_s23 = sshll.u32 %s1496_s22, 4  ;;  %p1907_p3 = scmp.eq.s32.totalorder %s1595_s21, 0  ;;  %s391_s23 = int_to_ptr.vmem [resolvable:$true] %s390_s23 }
   0x6   : > { %p1599_p2 = pnand %p1215_p0, %p378_p1  ;;  %s1456_s27 = scalar_lea.hbm %s1892_s1, 1024 }
   0x7   : > { %p1457_p6 = scmp.ne.s32.totalorder %s1892_s1, %s1456_s27  ;;  %p1463_p10 = scmp.lt.u32.totalorder %s1456_s27, %s1892_s1 }
   0x8   : > { %s1909_s14 = scalar_select %p1599_p2, 1, 0 }
   0x9   : > { %p1422_p4 = pneg %p1599_p2 }
   0xb   : > { %p1608_p5 = pnand %p1907_p3, %p1422_p4 }
   0xd   : > { %p1458_p7 = pneg %p1608_p5 }
   0xf   : > { %p1459_p8 = pnand %p1458_p7, %p1457_p6 }
  0x11   : > { %p1460_p9 = pneg %p1459_p8 }
  0x13   : > { %p1465_p11 = pnand %p1463_p10, %p1460_p9 }
  0x15   : > { %1468 = shalt.err (!%p1465_p11)
}
  0x16   : > { %s1469_s17 = scalar_lea.vmem %s391_s23, 1024  ;;  %p1477_p1 = scmp.lt.s32.totalorder %s391_s23, %s391_s23 }
  0x17   : > { %p1470_p12 = scmp.ne.s32.totalorder %s391_s23, %s1469_s17  ;;  %p1478_p4 = scmp.lt.s32.totalorder %s1469_s17, %s1469_s17 }
  0x19   : > { %p1472_p13 = pnand %p1470_p12, %p1458_p7  ;;  %p1479_p3 = por %p1478_p4, %p1477_p1 }
  0x1b   : > { %p1473_p0 = pneg %p1472_p13 }
  0x1d   : > { %p1480_p2 = pnand %p1479_p3, %p1473_p0 }
  0x1f   : > { %1483 = shalt.err (!%p1480_p2)
}
  0x20   : > { %s1497_s18 = smov 256   ;;  %s1498_s19 = smov 16  }
  0x21   : > { %1425 = dma.hbm_to_vmem [thread:$0]  (!%p1608_p5), %s1892_s1, 1024, %s391_s23, [#allocation4], %s1497_s18, %s1497_s18, %s1498_s19  }
  0x22   : > { %p1911_p6 = scmp.ne.s32.totalorder %s1909_s14, 0 }
  0x23   : > { %p1912_p8 = scmp.eq.s32.totalorder (!%p1911_p6), %s1595_s21, 0 }
  0x24   : > { %452 = sbr.rel (%p1911_p6) target bundleno = 1955 (0x7a3), region = 80 }
  0x2b   : > { %1489 = dma.done.wait (%p1912_p8), [#allocation4], 1024   ;;  %p1913_p7 = pmov %p1912_p8 }
  0x2c   : > { %v1499_v0 = vmov 0.0   ;;  %p498_p2 = scmp.lt.s32.totalorder %s1595_s21, 3  ;;  %v508_v1 = vld [vmem:[#allocation3 + $0x8] sm:$0xff]  ;;  %v510_v2 = vld [vmem:[#allocation3 + $0x18] sm:$0xff]  ;;  %v507_v3 = vld [vmem:[#allocation3] sm:$0xff]  ;;  %vm515_vm0 = vcmask 261120  }
  0x2d   : > { %1491 = vsyncadd (%p1913_p7), [#allocation4], 4294966272  ;;  %583 = vmatprep.mubr.f32.mxu0 %v1499_v0  ;;  %v1342_v4 = vpack.c.bf16 %v510_v2, %v508_v1  ;;  %v509_v5 = vld [vmem:[#allocation3 + $0x10] sm:$0xff]  ;;  %v512_v6 = vld [vmem:[#allocation3 + $0x28] sm:$0xff]  ;;  %vm1502_vm1 = vmmov 0   ;;  %s1503_s27 = smov 64  }
  0x2e   : > { %s1915_s21 = smov (!%p498_p2, %s1595_s21), 3  ;;  %v514_v7 = vld [vmem:[#allocation3 + $0x38] sm:$0xff]  ;;  %v1344_v8 = vpack.c.bf16 %v509_v5, %v507_v3  ;;  %v511_v10 = vld [vmem:[#allocation3 + $0x20] sm:$0xff]  ;;  %v513_v11 = vld [vmem:[#allocation3 + $0x30] sm:$0xff]  ;;  %vm934_vm2 = vcmask 523264   ;;  %s1505_s25 = smov 96  }
  0x2f   : > { %v1346_v9 = vpack.c.bf16 %v514_v7, %v512_v6  ;;  %s1220_s23 = sshll.u32 %s1915_s21, 3  ;;  %1343 = vmatprep.subr.bf16.mxu0 %v1342_v4  ;;  %v1348_v12 = vpack.c.bf16 %v513_v11, %v511_v10  ;;  %v717_v14 = vld [vmem:[%s1895_s4 + $0x80] sm:$0xff]  ;;  %v718_v15 = vld [vmem:[%s1895_s4 + $0x88] sm:$0xff]  ;;  %v719_v19 = vld [vmem:[%s1895_s4 + $0x90] sm:$0xff]  ;;  %s1143_s16 = sld [smem:[#allocation2]]  ;;  %vm1146_vm3 = vcmask 7168  }
  0x30   : > { %1345 = vmatpush1.bf16.msra.mxu0 %v1344_v8  ;;  %s501_s26 = scalar_lea.vmem %s1891_s0, %s1220_s23  ;;  %v701_v16 = vld [vmem:[%s1895_s4] sm:$0xff]  ;;  %v1350_v17 = vpack.c.bf16 %v718_v15, %v717_v14  ;;  %v702_v18 = vld [vmem:[%s1895_s4 + $0x8] sm:$0xff]  ;;  %v720_v20 = vld [vmem:[%s1895_s4 + $0x98] sm:$0xff]  ;;  %s505_s19 = scalar_lea.vmem %s1906_s15, %s1220_s23 }
  0x31   : > { %1347 = vmatprep.subr.bf16.mxu0 %v1346_v9  ;;  %v506_v13 = vld [vmem:[%s501_s26] sm:$0xff]  ;;  %v1352_v21 = vpack.c.bf16 %v702_v18, %v701_v16  ;;  %v1354_v22 = vpack.c.bf16 %v720_v20, %v719_v19  ;;  %v703_v23 = vld [vmem:[%s1895_s4 + $0x10] sm:$0xff]  ;;  %v704_v24 = vld [vmem:[%s1895_s4 + $0x18] sm:$0xff] }
  0x32   : > { %v721_v25 = vld [vmem:[%s1895_s4 + $0xa0] sm:$0xff]  ;;  %1351 = vmatprep.subr.bf16.mxu1 %v1350_v17  ;;  %v722_v26 = vld [vmem:[%s1895_s4 + $0xa8] sm:$0xff]  ;;  %v1356_v27 = vpack.c.bf16 %v704_v24, %v703_v23  ;;  %v723_v31 = vld [vmem:[%s1895_s4 + $0xb0] sm:$0xff] }
  0x33   : > { %1353 = vmatpush3.bf16.msra.mxu1 %v1352_v21  ;;  %v1358_v28 = vpack.c.bf16 %v722_v26, %v721_v25  ;;  %v705_v29 = vld [vmem:[%s1895_s4 + $0x20] sm:$0xff]  ;;  %v706_v30 = vld [vmem:[%s1895_s4 + $0x28] sm:$0xff]  ;;  %v724_v32 = vld [vmem:[%s1895_s4 + $0xb8] sm:$0xff] }
  0x34   : > { %1349 = vmatpush1.bf16.msra.mxu0 %v1348_v12  ;;  %1355 = vmatprep.subr.bf16.mxu1 %v1354_v22  ;;  %v1360_v33 = vpack.c.bf16 %v706_v30, %v705_v29  ;;  %v1362_v34 = vpack.c.bf16 %v724_v32, %v723_v31  ;;  %v707_v35 = vld [vmem:[%s1895_s4 + $0x30] sm:$0xff]  ;;  %v708_v36 = vld [vmem:[%s1895_s4 + $0x38] sm:$0xff]  ;;  %v725_v37 = vld [vmem:[%s1895_s4 + $0xc0] sm:$0xff] }
  0x35   : > { %v726_v38 = vld [vmem:[%s1895_s4 + $0xc8] sm:$0xff]  ;;  %v1364_v39 = vpack.c.bf16 %v708_v36, %v707_v35  ;;  %v709_v41 = vld [vmem:[%s1895_s4 + $0x40] sm:$0xff]  ;;  %v727_v43 = vld [vmem:[%s1895_s4 + $0xd0] sm:$0xff] }
  0x36   : > { %v1366_v40 = vpack.c.bf16 %v726_v38, %v725_v37  ;;  %v710_v42 = vld [vmem:[%s1895_s4 + $0x48] sm:$0xff]  ;;  %v728_v44 = vld [vmem:[%s1895_s4 + $0xd8] sm:$0xff]  ;;  %v711_v47 = vld [vmem:[%s1895_s4 + $0x50] sm:$0xff] }
  0x37   : > { %1222 = vmatmul.mubr.msk.f32.vlgmr.msra.gmra.mrb[0].mxu0 %vm515_vm0, %v506_v13  ;;  %1357 = vmatpush3.bf16.msra.mxu1 %v1356_v27  ;;  %v1368_v45 = vpack.c.bf16 %v710_v42, %v709_v41  ;;  %v1370_v46 = vpack.c.bf16 %v728_v44, %v727_v43  ;;  %v712_v48 = vld [vmem:[%s1895_s4 + $0x58] sm:$0xff]  ;;  %v729_v49 = vld [vmem:[%s1895_s4 + $0xe0] sm:$0xff]  ;;  %v730_v50 = vld [vmem:[%s1895_s4 + $0xe8] sm:$0xff]  ;;  %v638_v41 = vlaneseq }
  0x38   : > { %1359 = vmatprep.subr.bf16.mxu1 %v1358_v28  ;;  %v1372_v51 = vpack.c.bf16 %v712_v48, %v711_v47  ;;  %v1374_v52 = vpack.c.bf16 %v730_v50, %v729_v49  ;;  %v713_v53 = vld [vmem:[%s1895_s4 + $0x60] sm:$0xff]  ;;  %v714_v54 = vld [vmem:[%s1895_s4 + $0x68] sm:$0xff]  ;;  %v731_v55 = vld [vmem:[%s1895_s4 + $0xf0] sm:$0xff]  ;;  %1320 = vmatprep.mubr.msk.f32.mxu0 %vm1502_vm1, %v1499_v0 }
  0x39   : > { %v732_v56 = vld [vmem:[%s1895_s4 + $0xf8] sm:$0xff]  ;;  %v1376_v57 = vpack.c.bf16 %v714_v54, %v713_v53  ;;  %v715_v59 = vld [vmem:[%s1895_s4 + $0x70] sm:$0xff]  ;;  %v639_v43 = vshrl.u32 %v638_v41, 7  ;;  %v627_v49 = vld [vmem:[%s1893_s2] sm:$0x3] }
  0x3a   : > { %v1378_v58 = vpack.c.bf16 %v732_v56, %v731_v55  ;;  %v716_v60 = vld [vmem:[%s1895_s4 + $0x78] sm:$0xff] }
  0x3b   : > { %1361 = vmatpush3.bf16.msra.mxu1 %v1360_v33  ;;  %v1380_v61 = vpack.c.bf16 %v716_v60, %v715_v59 }
  0x3c   : > { %1363 = vmatprep.subr.bf16.mxu1 %v1362_v34 }
  0x3f   : > { %1365 = vmatpush3.bf16.msra.mxu1 %v1364_v39  ;;  %v1500_v39 = vmov 1966171168  }
  0x40   : > { %1367 = vmatprep.subr.bf16.mxu1 %v1366_v40  ;;  %v636_v40 = vunpack.c.l.s4 %v1500_v39 }
  0x42   : > { %v637_v42 = vunpack.c.0.s8 %v636_v40 }
  0x43   : > { %1369 = vmatpush3.bf16.msra.mxu1 %v1368_v45 }
  0x44   : > { %1371 = vmatprep.subr.bf16.mxu1 %v1370_v46  ;;  %v1742_v45 = vsub.s32 %v637_v42, %v639_v43 }
  0x47   : > { %1373 = vmatpush3.bf16.msra.mxu1 %v1372_v51  ;;  %v1749_v51 = vsub.s32 0, %v639_v43 }
  0x48   : > { %1375 = vmatprep.subr.bf16.mxu1 %v1374_v52  ;;  %v659_v52 = vsub.s32 1, %v639_v43 }
  0x4b   : > { %1377 = vmatpush3.bf16.msra.mxu1 %v1376_v57 }
  0x4c   : > { %1379 = vmatprep.subr.bf16.mxu1 %v1378_v58 }
  0x4f   : > { %1381 = vmatpush3.bf16.msra.mxu1 %v1380_v61 }
 0x10a   : > { %v585_v62 = vpop.f32.mrb[0].mxu0 }
 0x10b   : > { %v590_v63 = vmul.f32 %v585_v62, %v585_v62  ;;  %v592_v1 = vrot.slane %v585_v62, 4  ;;  %v587_v2 = vpop.f32.mrb[1].mxu0 }
 0x10c   : > { %v591_v3 = vmul.f32 %v587_v2, %v587_v2  ;;  %v598_v4 = vrot.slane %v587_v2, 4 }
 0x10d   : > { %v593_v5 = vadd.f32 %v592_v1, %v585_v62  ;;  %v604_v6 = vrot.slane %v590_v63, 4 }
 0x10e   : > { %v599_v7 = vadd.f32 %v598_v4, %v587_v2  ;;  %v610_v8 = vrot.slane %v591_v3, 4 }
 0x10f   : > { %v594_v9 = vrot.slane %v593_v5, 2  ;;  %v605_v10 = vadd.f32 %v604_v6, %v590_v63  ;;  %v651_v63 = vld [vmem:[%s1894_s3] sm:$0x3] }
 0x110   : > { %v600_v11 = vrot.slane %v599_v7, 2  ;;  %v611_v12 = vadd.f32 %v610_v8, %v591_v3 }
 0x111   : > { %v595_v13 = vadd.f32 %v594_v9, %v593_v5  ;;  %v606_v14 = vrot.slane %v605_v10, 2 }
 0x112   : > { %v601_v15 = vadd.f32 %v600_v11, %v599_v7  ;;  %v612_v16 = vrot.slane %v611_v12, 2  ;;  %v1501_v11 = vmov 0.0|0.0  }
 0x113   : > { %v596_v17 = vrot.slane %v595_v13, 1  ;;  %v607_v18 = vadd.f32 %v606_v14, %v605_v10  ;;  %1382 = vmatprep.subr.bf16.mxu0 %v1501_v11  ;;  %1406 = vmatprep.subr.bf16.mxu1 %v1501_v11 }
 0x114   : > { %v602_v19 = vrot.slane %v601_v15, 1  ;;  %v613_v20 = vadd.f32 %v612_v16, %v611_v12  ;;  %v845_v12 = vld [vmem:[%s1898_s7 + $0x10] sm:$0xff]  ;;  %v848_v16 = vld [vmem:[%s1898_s7 + $0x28] sm:$0xff] }
 0x115   : > { %v597_v21 = vadd.f32 %v596_v17, %v595_v13  ;;  %v608_v22 = vrot.slane %v607_v18, 1  ;;  %v846_v13 = vld [vmem:[%s1898_s7 + $0x18] sm:$0xff] }
 0x116   : > { %v614_v23 = vrot.slane %v613_v20, 1  ;;  %v603_v24 = vadd.f32 %v602_v19, %v601_v15  ;;  %v1386_v14 = vpack.c.bf16 %v846_v13, %v845_v12  ;;  %v847_v15 = vld [vmem:[%s1898_s7 + $0x20] sm:$0xff]  ;;  %v850_v19 = vld [vmem:[%s1898_s7 + $0x38] sm:$0xff] }
 0x117   : > { %v609_v25 = vadd.f32 %v608_v22, %v607_v18  ;;  %v617_v26 = vmul.f32 0.125, %v597_v21  ;;  %v1389_v17 = vpack.c.bf16 %v848_v16, %v847_v15  ;;  %v849_v18 = vld [vmem:[%s1898_s7 + $0x30] sm:$0xff]  ;;  %v851_v21 = vld [vmem:[%s1898_s7 + $0x40] sm:$0xff]  ;;  %v852_v22 = vld [vmem:[%s1898_s7 + $0x48] sm:$0xff] }
 0x118   : > { %v615_v27 = vadd.f32 %v614_v23, %v613_v20  ;;  %v618_v28 = vmul.f32 0.125, %v603_v24  ;;  %v1392_v20 = vpack.c.bf16 %v850_v19, %v849_v18  ;;  %v1395_v23 = vpack.c.bf16 %v852_v22, %v851_v21  ;;  %v853_v24 = vld [vmem:[%s1898_s7 + $0x50] sm:$0xff]  ;;  %v990_v18 = vld [vmem:[%s1901_s10] sm:$0xff]  ;;  %v991_v19 = vld [vmem:[%s1901_s10 + $0x8] sm:$0xff] }
 0x119   : > { %v619_v29 = vmul.f32 0.125, %v609_v25  ;;  %v621_v30 = vmul.f32 %v617_v26, %v617_v26  ;;  %v854_v25 = vld [vmem:[%s1898_s7 + $0x58] sm:$0xff] }
 0x11a   : > { %v620_v31 = vmul.f32 0.125, %v615_v27  ;;  %v622_v32 = vmul.f32 %v618_v28, %v618_v28  ;;  %v855_v27 = vld [vmem:[%s1898_s7 + $0x60] sm:$0xff] }
 0x11b   : > { %v623_v33 = vsub.f32 %v619_v29, %v621_v30  ;;  %v857_v30 = vld [vmem:[%s1898_s7 + $0x70] sm:$0xff] }
 0x11c   : > { %v624_v34 = vsub.f32 %v620_v31, %v622_v32  ;;  %v858_v31 = vld [vmem:[%s1898_s7 + $0x78] sm:$0xff] }
 0x11d   : > { %v625_v35 = vmax.f32 %v623_v33, 0.0  ;;  %v1404_v32 = vpack.c.bf16 %v858_v31, %v857_v30  ;;  %v996_v31 = vld [vmem:[%s1901_s10 + $0x30] sm:$0xff] }
 0x11e   : > { %v626_v36 = vmax.f32 %v624_v34, 0.0 }
 0x11f   : > { %v628_v37 = vadd.f32 1e-05, %v625_v35 }
 0x120   : > { %v629_v38 = vadd.f32 1e-05, %v626_v36 }
 0x121   : > { %1446 = vrsqrt.f32 %v628_v37 }
 0x122   : > { %1448 = vrsqrt.f32 %v629_v38 }
 0x12b   : > { %v1447_v44 = vpop.eup %1446 }
 0x12c   : > { %v1449_v46 = vpop.eup %1448 }
 0x12d   : > { %v634_v47 = vcombine.low %v1447_v44, %v1449_v46 }
 0x12f   : > { %v641_v48 = vrot.slane %v634_v47, %v1742_v45 }
 0x131   : > { %v648_v50 = vrot.slane %v641_v48, %v1742_v45 }
 0x133   : > { %v650_v53 = vmul.f32 %v648_v50, %v627_v49 }
 0x135   : > { %v656_v54 = vrot.slane %v650_v53, %v1749_v51  ;;  %v660_v55 = vrot.slane %v650_v53, %v659_v52 }
 0x137   : > { %v663_v56 = vmul.f32 %v656_v54, %v617_v26  ;;  %v664_v57 = vmul.f32 %v660_v55, %v618_v28  ;;  %v685_v58 = vmul.f32 %v660_v55, %v587_v2  ;;  %v684_v59 = vmul.f32 %v656_v54, %v585_v62  ;;  %v843_v62 = vld [vmem:[%s1898_s7] sm:$0xff]  ;;  %v844_v2 = vld [vmem:[%s1898_s7 + $0x8] sm:$0xff] }
 0x138   : > { %v1383_v10 = vpack.c.bf16 %v844_v2, %v843_v62  ;;  %v1398_v26 = vpack.c.bf16 %v854_v25, %v853_v24  ;;  %v856_v28 = vld [vmem:[%s1898_s7 + $0x68] sm:$0xff]  ;;  %v992_v25 = vld [vmem:[%s1901_s10 + $0x10] sm:$0xff] }
 0x139   : > { %v667_v60 = vcombine.low %v663_v56, %v664_v57  ;;  %v1401_v29 = vpack.c.bf16 %v856_v28, %v855_v27  ;;  %v821_v56 = vld [vmem:[%s1896_s5] sm:$0x1] }
 0x13a   : > { %1384 = vmatpush3.bf16.msra.mxu0 %v1383_v10  ;;  %v994_v28 = vld [vmem:[%s1901_s10 + $0x20] sm:$0xff] }
 0x13b   : > { %v674_v61 = vrot.slane %v667_v60, %v1742_v45  ;;  %1385 = vmatprep.subr.bf16.mxu0 %v1501_v11 }
 0x13d   : > { %v681_v1 = vrot.slane %v674_v61, %v1742_v45 }
 0x13e   : > { %1387 = vmatpush3.bf16.msra.mxu0 %v1386_v14 }
 0x13f   : > { %v683_v3 = vsub.f32 %v651_v63, %v681_v1  ;;  %1388 = vmatprep.subr.bf16.mxu0 %v1501_v11 }
 0x141   : > { %v694_v4 = vrot.slane %v683_v3, %v659_v52  ;;  %v690_v5 = vrot.slane %v683_v3, %v1749_v51 }
 0x142   : > { %1390 = vmatpush3.bf16.msra.mxu0 %v1389_v17 }
 0x143   : > { %v698_v6 = vadd.f32 %v694_v4, %v685_v58  ;;  %v697_v7 = vadd.f32 %v690_v5, %v684_v59  ;;  %1391 = vmatprep.subr.bf16.mxu0 %v1501_v11  ;;  %v825_v59 = vld [vmem:[%s1897_s6] sm:$0x1] }
 0x145   : > { %v700_v8 = vmax.f32 %v698_v6, 0.0  ;;  %v699_v9 = vmax.f32 %v697_v7, 0.0 }
 0x146   : > { %1393 = vmatpush3.bf16.msra.mxu0 %v1392_v20  ;;  %v1407_v20 = vpack.c.bf16 %v991_v19, %v990_v18 }
 0x147   : > { %797 = vmatprep.mubr.f32.mxu1 %v700_v8  ;;  %1394 = vmatprep.subr.bf16.mxu0 %v1501_v11 }
 0x148   : > { %798 = vmatmul.mubr.f32.vlgmr.msra.gmra.mrb[0].mxu1 %v699_v9 }
 0x149   : > { %1339 = vmatprep.mubr.msk.f32.mxu1 %vm1502_vm1, %v1499_v0  ;;  %1408 = vmatpush3.bf16.msra.mxu1 %v1407_v20  ;;  %v1144_v20 = vstv %s1143_s16 }
 0x14a   : > { %1396 = vmatpush3.bf16.msra.mxu0 %v1395_v23  ;;  %1409 = vmatprep.subr.bf16.mxu1 %v1501_v11 }
 0x14b   : > { %1397 = vmatprep.subr.bf16.mxu0 %v1501_v11 }
 0x14e   : > { %1399 = vmatpush3.bf16.msra.mxu0 %v1398_v26  ;;  %v993_v26 = vld [vmem:[%s1901_s10 + $0x18] sm:$0xff] }
 0x14f   : > { %1400 = vmatprep.subr.bf16.mxu0 %v1501_v11  ;;  %v1410_v27 = vpack.c.bf16 %v993_v26, %v992_v25 }
 0x151   : > { %1411 = vmatpush3.bf16.msra.mxu1 %v1410_v27 }
 0x152   : > { %1402 = vmatpush3.bf16.msra.mxu0 %v1401_v29  ;;  %1412 = vmatprep.subr.bf16.mxu1 %v1501_v11  ;;  %v995_v29 = vld [vmem:[%s1901_s10 + $0x28] sm:$0xff] }
 0x153   : > { %1403 = vmatprep.subr.bf16.mxu0 %v1501_v11  ;;  %v1413_v30 = vpack.c.bf16 %v995_v29, %v994_v28 }
 0x155   : > { %1414 = vmatpush3.bf16.msra.mxu1 %v1413_v30 }
 0x156   : > { %1405 = vmatpush3.bf16.msra.mxu0 %v1404_v32  ;;  %1415 = vmatprep.subr.bf16.mxu1 %v1501_v11  ;;  %v997_v32 = vld [vmem:[%s1901_s10 + $0x38] sm:$0xff]  ;;  %v950_v11 = vld [vmem:[%s1899_s8] sm:$0x1] }
 0x21b   : > { %v1259_v33 = vpop.f32.mrb[0].mxu1 }
 0x21c   : > { %v1260_v34 = vpop.f32.mrb[1].mxu1 }
 0x21d   : > { %v1261_v35 = vadd.f32 %v1260_v34, %v1259_v33  ;;  %v1416_v33 = vpack.c.bf16 %v997_v32, %v996_v31 }
 0x21f   : > { %v803_v36 = vmul.f32 %v1261_v35, %v1261_v35  ;;  %v804_v37 = vrot.slane %v1261_v35, 4  ;;  %1417 = vmatpush3.bf16.msra.mxu1 %v1416_v33 }
 0x221   : > { %v805_v38 = vadd.f32 %v1261_v35, %v804_v37  ;;  %v810_v39 = vrot.slane %v803_v36, 4 }
 0x223   : > { %v806_v40 = vrot.slane %v805_v38, 2  ;;  %v811_v41 = vadd.f32 %v810_v39, %v803_v36  ;;  %v972_v39 = vld [vmem:[%s1900_s9] sm:$0x1] }
 0x225   : > { %v807_v42 = vadd.f32 %v806_v40, %v805_v38  ;;  %v812_v43 = vrot.slane %v811_v41, 2 }
 0x227   : > { %v808_v44 = vrot.slane %v807_v42, 1  ;;  %v813_v46 = vadd.f32 %v812_v43, %v811_v41 }
 0x229   : > { %v809_v47 = vadd.f32 %v808_v44, %v807_v42  ;;  %v814_v48 = vrot.slane %v813_v46, 1 }
 0x22b   : > { %v815_v49 = vadd.f32 %v814_v48, %v813_v46  ;;  %v816_v50 = vmul.f32 0.125, %v809_v47 }
 0x22d   : > { %v817_v52 = vmul.f32 0.125, %v815_v49  ;;  %v818_v0 = vmul.f32 %v816_v50, %v816_v50 }
 0x22f   : > { %v819_v53 = vsub.f32 %v817_v52, %v818_v0 }
 0x231   : > { %v820_v54 = vmax.f32 %v819_v53, 0.0 }
 0x233   : > { %v822_v55 = vadd.f32 1e-05, %v820_v54 }
 0x235   : > { %1450 = vrsqrt.f32 %v822_v55 }
 0x23f   : > { %v1451_v57 = vpop.eup %1450 }
 0x240   : > { %v824_v58 = vmul.f32 %v1451_v57, %v821_v56 }
 0x242   : > { %v832_v60 = vrot.slane %v824_v58, %v1749_v51  ;;  %v826_v61 = vmul.f32 %v824_v58, %v816_v50 }
 0x244   : > { %v827_v63 = vsub.f32 %v825_v59, %v826_v61  ;;  %v834_v1 = vmul.f32 %v1261_v35, %v832_v60 }
 0x246   : > { %v839_v3 = vrot.slane %v827_v63, %v1749_v51 }
 0x248   : > { %v841_v4 = vadd.f32 %v839_v3, %v834_v1 }
 0x24a   : > { %v842_v5 = vmax.f32 %v841_v4, 0.0 }
 0x24c   : > { %1321 = vmatmul.mubr.f32.vlgmr.msra.gmra.mrb[2].mxu0 %v842_v5 }
 0x31f   : > { %v925_v6 = vpop.f32.mrb[2].mxu0 }
 0x320   : > { %v1322_v7 = vpop.f32.mrb[3].mxu0  ;;  %v929_v8 = vmul.f32 %v925_v6, %v925_v6 }
 0x322   : > { %931 = vrot.lane.b32.xlu0 %v929_v8, %s1503_s27  ;;  %v1092_v8 = vld [vmem:[%s1902_s11] sm:$0x1] }
 0x394   : > { %v932_v9 = vpop.permute.xlu0 %931 }
 0x395   : > { %v935_v62 = vsel %vm934_vm2, %v925_v6, %v932_v9 }
 0x396   : > { %v936_v2 = vrot.slane %v935_v62, 4 }
 0x398   : > { %v937_v10 = vadd.f32 %v936_v2, %v935_v62  ;;  %v1114_v2 = vld [vmem:[%s1903_s12] sm:$0x1] }
 0x39a   : > { %v938_v12 = vrot.slane %v937_v10, 2 }
 0x39c   : > { %v939_v13 = vadd.f32 %v938_v12, %v937_v10 }
 0x39e   : > { %v940_v14 = vrot.slane %v939_v13, 1 }
 0x3a0   : > { %v941_v15 = vadd.f32 %v940_v14, %v939_v13 }
 0x3a2   : > { %v942_v16 = vmul.f32 0.125, %v941_v15 }
 0x3a4   : > { %v943_v17 = vmul.f32 %v942_v16, %v942_v16 }
 0x3a6   : > { %945 = vrot.lane.b32.xlu0 %v943_v17, %s1503_s27 }
 0x418   : > { %v946_v21 = vpop.permute.xlu0 %945 }
 0x419   : > { %v948_v22 = vsub.f32 %v942_v16, %v946_v21 }
 0x41b   : > { %v949_v23 = vmax.f32 %v948_v22, 0.0 }
 0x41d   : > { %v951_v24 = vadd.f32 1e-05, %v949_v23 }
 0x41f   : > { %1452 = vrsqrt.f32 %v951_v24 }
 0x429   : > { %v1453_v34 = vpop.eup %1452 }
 0x42a   : > { %v960_v35 = vrot.slane %v1453_v34, %v1742_v45 }
 0x42c   : > { %v967_v36 = vrot.slane %v960_v35, %v1742_v45 }
 0x42e   : > { %968 = vrot.lane.b32.xlu1 %v967_v36, %s1503_s27  ;;  %s1504_s27 = smov 32  }
 0x4a0   : > { %v969_v37 = vpop.permute.xlu1 %968 }
 0x4a1   : > { %v971_v38 = vmul.f32 %v969_v37, %v950_v11 }
 0x4a3   : > { %v973_v40 = vmul.f32 %v971_v38, %v942_v16  ;;  %v979_v41 = vrot.slane %v971_v38, %v1749_v51  ;;  %v1224_v16 = vld [vmem:[%s1904_s13] ss:$0 sm:$0xff] }
 0x4a5   : > { %v974_v42 = vsub.f32 %v972_v39, %v973_v40  ;;  %v981_v43 = vmul.f32 %v979_v41, %v925_v6 }
 0x4a7   : > { %v986_v44 = vrot.slane %v974_v42, %v1749_v51 }
 0x4a9   : > { %v988_v46 = vadd.f32 %v986_v44, %v981_v43 }
 0x4ab   : > { %v989_v47 = vmax.f32 %v988_v46, 0.0 }
 0x4ad   : > { %1340 = vmatmul.mubr.msk.f32.vlgmr.msra.gmra.mrb[2].mxu1 %vm934_vm2, %v989_v47 }
 0x580   : > { %v1067_v48 = vpop.f32.mrb[2].mxu1 }
 0x581   : > { %v1071_v49 = vmul.f32 %v1067_v48, %v1067_v48  ;;  %v1341_v50 = vpop.f32.mrb[3].mxu1 }
 0x583   : > { %1073 = vrot.lane.b32.xlu1 %v1071_v49, %s1504_s27 }
 0x5f5   : > { %v1074_v52 = vpop.permute.xlu1 %1073 }
 0x5f6   : > { %v1076_v0 = vsel %vm515_vm0, %v1067_v48, %v1074_v52 }
 0x5f7   : > { %v1077_v53 = vsel %vm934_vm2, %v1076_v0, 0.0 }
 0x5f8   : > { %v1078_v54 = vrot.slane %v1077_v53, 4 }
 0x5fa   : > { %v1079_v55 = vadd.f32 %v1078_v54, %v1077_v53 }
 0x5fc   : > { %v1080_v56 = vrot.slane %v1079_v55, 2 }
 0x5fe   : > { %v1081_v57 = vadd.f32 %v1080_v56, %v1079_v55 }
 0x600   : > { %v1082_v58 = vrot.slane %v1081_v57, 1 }
 0x602   : > { %v1083_v59 = vadd.f32 %v1082_v58, %v1081_v57 }
 0x604   : > { %v1084_v60 = vmul.f32 0.125, %v1083_v59 }
 0x606   : > { %v1085_v61 = vmul.f32 %v1084_v60, %v1084_v60 }
 0x608   : > { %1087 = vrot.lane.b32.xlu0 %v1085_v61, %s1504_s27 }
 0x67a   : > { %v1088_v63 = vpop.permute.xlu0 %1087 }
 0x67b   : > { %v1090_v1 = vsub.f32 %v1084_v60, %v1088_v63 }
 0x67d   : > { %v1091_v3 = vmax.f32 %v1090_v1, 0.0 }
 0x67f   : > { %v1093_v4 = vadd.f32 1e-05, %v1091_v3 }
 0x681   : > { %1454 = vrsqrt.f32 %v1093_v4 }
 0x68b   : > { %v1455_v5 = vpop.eup %1454 }
 0x68c   : > { %v1102_v6 = vrot.slane %v1455_v5, %v1742_v45 }
 0x68e   : > { %v1109_v7 = vrot.slane %v1102_v6, %v1742_v45 }
 0x690   : > { %1110 = vrot.lane.b32.xlu1 %v1109_v7, %s1505_s25 }
 0x702   : > { %v1111_v9 = vpop.permute.xlu1 %1110 }
 0x703   : > { %v1113_v62 = vmul.f32 %v1111_v9, %v1092_v8 }
 0x705   : > { %v1115_v10 = vmul.f32 %v1113_v62, %v1084_v60  ;;  %v1121_v12 = vrot.slane %v1113_v62, %v1749_v51 }
 0x707   : > { %v1116_v13 = vsub.f32 %v1114_v2, %v1115_v10  ;;  %v1123_v14 = vmul.f32 %v1121_v12, %v1067_v48 }
 0x709   : > { %v1128_v45 = vrot.slane %v1116_v13, %v1749_v51 }
 0x70b   : > { %v1130_v15 = vadd.f32 %v1128_v45, %v1123_v14 }
 0x70d   : > { %v1131_v17 = vmax.f32 %v1130_v15, 0.0 }
 0x70f   : > { %v1139_v18 = vmul.f32 %v1224_v16, %v1131_v17 }
 0x711   : > { %v1140_v19 = vsel %vm515_vm0, %v1139_v18, 0.0 }
 0x712   : > { %1141 = vadd.xlane.f32.xlu0 %v1140_v19 }
 0x79f   : > { %v1142_v21 = vpop.xlane.xlu0 %1141 }
 0x7a0   : > { %v1145_v51 = vadd.f32 %v1144_v20, %v1142_v21 }
 0x7a2   : > { %1147 = vst.msk [vmem:[%s505_s19] sm:$0xff] %vm1146_vm3, %v1145_v51 }
 0x7a3 PF: > { %s27_s20 = sadd.s32 1, %s1494_s20  }
 0x7a4   : > { %p24_p3 = scmp.ge.s32.totalorder %s27_s20, 6  }
 0x7a6   :  { %26 = sbr.rel (!%p24_p3) target bundleno = 3 (0x3), region = 115 }
 0x7ad   :  { %1167 = vsyncpa [#allocation4], 1 }
 0x7ae   :  { %1169 = vsyncpa [#allocation4 + $0x1], 1 }

</bundles_post_ra>
